<compile_context>
chip_gen: v6e
topology: v6e:2x2x1
jax: 0.10.0
libtpu: 0.0.40
codegen_flags: <defaults>
</compile_context>

<pallas_src>
import functools

import jax
import jax.numpy as jnp
from jax.experimental import pallas as pl
from jax.experimental.pallas import tpu as pltpu


def _round_up(x, m):
    return ((x + m - 1) // m) * m


def _cdiv(a, b):
    return -(-a // b)


def _head_kernel(feat_ref, w1_ref, b1_ref, w2_ref, b2_ref, out_ref, acc_ref,
                 *, inv_s, seq_len, ts, mask_seq):
    s = pl.program_id(1)

    @pl.when(s == 0)
    def _():
        acc_ref[...] = jnp.zeros_like(acc_ref)

    # Partial sum over this sequence tile (VPU/XLU), accumulated in f32.
    tile = feat_ref[...]
    if tile.dtype != jnp.float32:
        tile = tile.astype(jnp.float32)
    if mask_seq:
        # Tail tile: rows past the true sequence length hold unspecified
        # (OOB) data -- zero them before the reduction.
        seq_idx = jax.lax.broadcasted_iota(jnp.int32, tile.shape, 1) + s * ts
        tile = jnp.where(seq_idx < seq_len, tile, 0.0)
    acc_ref[...] += jnp.sum(tile, axis=1)

    @pl.when(s == pl.num_programs(1) - 1)
    def _():
        # Mean with exact compile-time 1/S (masked rows contributed 0).
        x = acc_ref[...] * inv_s                                   # (TB, H) f32
        # Dropout is identity in eval mode (no-op here).
        w1 = w1_ref[...]
        h = jnp.tanh(
            jnp.dot(x.astype(w1.dtype), w1, preferred_element_type=jnp.float32)
            + b1_ref[...].astype(jnp.float32))                     # (TB, H)
        w2 = w2_ref[...]
        logits = (
            jnp.dot(h.astype(w2.dtype), w2, preferred_element_type=jnp.float32)
            + b2_ref[...].astype(jnp.float32))                     # (TB, Lp)
        out_ref[...] = logits.astype(out_ref.dtype)


def residue_roberta_classification_head(features, dense_weight, dense_bias,
                                        out_proj_weight, out_proj_bias):
    """features: (B, S, H).
    dense_weight: (H, H), out_proj_weight: (L, H)  -- PyTorch nn.Linear layout
    (out_features, in_features); dense_bias: (H,); out_proj_bias: (L,).
    Returns logits (B, L) float32."""
    B, S, H = features.shape
    L = out_proj_weight.shape[0]
    LANES = 128

    # Explicit transpose to (in, out) so the kernel computes x @ W + b
    # (PyTorch stores (out, in) -- a silent-wrong trap for the square dense W).
    w1 = dense_weight.T                    # (H, H)
    w2 = out_proj_weight.T                 # (H, L)

    itemsize = jnp.dtype(features.dtype).itemsize
    w_itemsize = jnp.dtype(w1.dtype).itemsize
    target_tile_bytes = 4 * 1024 * 1024    # per feature buffer

    # ---- batch tile ------------------------------------------------------
    if B <= 8:
        TB = B                             # block == full dim (legal)
    else:
        # Aim for >= 2 programs on the parallel axis (v7x megacore), cap 128.
        TB = min(128, _round_up(_cdiv(B, 2), 8))
        # Shrink TB before letting the minimum-TS (=8) tile blow the budget
        # (matters most on v7x: 32 MiB scoped / 64 MiB physical VMEM).
        max_tb = max(8, ((target_tile_bytes // max(1, 8 * H * itemsize)) // 8) * 8)
        TB = max(8, min(TB, max_tb))
    grid_b = _cdiv(B, TB)

    # ---- sequence tile: balanced to minimize tail waste ------------------
    row_bytes = max(1, TB * H * itemsize)
    ts_cap = max(8, ((target_tile_bytes // row_bytes) // 8) * 8)
    if S <= ts_cap:
        TS = S                             # block == full dim (legal)
    else:
        TS = _round_up(_cdiv(S, _cdiv(S, ts_cap)), 8)
    grid_s = _cdiv(S, TS)

    # Lane-dense output: pad num_labels to a multiple of 128 lanes.
    L_pad = _round_up(max(L, 1), LANES)

    # Only the tiny weights/biases are padded/reshaped on the host.
    b1 = dense_bias.reshape(1, H)
    w2_p = jnp.pad(w2, ((0, 0), (0, L_pad - L)))
    b2_p = jnp.pad(out_proj_bias.reshape(1, L), ((0, 0), (0, L_pad - L)))

    grid = (grid_b, grid_s)

    # ---- explicit VMEM budget (conservative; also covers the fallback
    # where weights are double-buffered) -----------------------------------
    feat_tile_b = TB * TS * H * itemsize
    feat_tmp_b = TB * TS * H * 4                      # f32 cast / mask temporaries
    w_resident_b = 2 * ((H * H + 8 * H) * w_itemsize
                        + (H * L_pad + 8 * L_pad) * jnp.dtype(w2.dtype).itemsize)
    acc_b = max(TB, 8) * H * 4
    out_b = 2 * max(TB, 8) * L_pad * 4
    vmem_needed = 3 * feat_tile_b + 2 * feat_tmp_b + w_resident_b + acc_b + out_b
    vmem_limit = int(max(16 * 1024 * 1024,
                         min(int(1.5 * vmem_needed) + (2 << 20),
                             48 * 1024 * 1024)))

    cost = pl.CostEstimate(
        flops=int(2 * B * H * (H + L_pad) + B * S * H),
        transcendentals=int(B * H),
        bytes_accessed=int(B * S * H * itemsize
                           + (H * H + H + H * L_pad + L_pad) * w_itemsize
                           + B * L_pad * 4),
    )

    kernel = functools.partial(_head_kernel, inv_s=1.0 / S, seq_len=S, ts=TS,
                               mask_seq=(S % TS != 0))

    def _call(use_pipeline_modes):
        if use_pipeline_modes:
            feat_spec = pl.BlockSpec((TB, TS, H), lambda b, s: (b, s, 0),
                                     pipeline_mode=pl.Buffered(3))
            w_kw = dict(pipeline_mode=pl.Buffered(1))  # DMA'd once; single buffer
        else:
            feat_spec = pl.BlockSpec((TB, TS, H), lambda b, s: (b, s, 0))
            w_kw = {}
        return pl.pallas_call(
            kernel,
            out_shape=jax.ShapeDtypeStruct((B, L_pad), jnp.float32),
            grid=grid,
            in_specs=[
                feat_spec,                                           # features tile
                pl.BlockSpec((H, H), lambda b, s: (0, 0), **w_kw),   # dense weight
                pl.BlockSpec((1, H), lambda b, s: (0, 0), **w_kw),   # dense bias
                pl.BlockSpec((H, L_pad), lambda b, s: (0, 0), **w_kw),  # out_proj W
                pl.BlockSpec((1, L_pad), lambda b, s: (0, 0), **w_kw),  # out_proj b
            ],
            out_specs=pl.BlockSpec((TB, L_pad), lambda b, s: (b, 0)),
            scratch_shapes=[pltpu.VMEM((TB, H), jnp.float32)],
            compiler_params=pltpu.CompilerParams(
                dimension_semantics=("parallel", "arbitrary"),
                vmem_limit_bytes=vmem_limit,
            ),
            cost_estimate=cost,
        )(features, w1, b1, w2_p, b2_p)

    try:
        out = _call(True)
    except Exception:
        # Fallback for jax versions that reject BlockSpec pipeline_mode /
        # Buffered(1); identical semantics, default double-buffering.
        out = _call(False)

    return out[:, :L]


def _reference(features, dense_weight, dense_bias, out_proj_weight, out_proj_bias):
    x = features.mean(axis=1)
    x = jnp.tanh(x @ dense_weight.T + dense_bias)
    return x @ out_proj_weight.T + out_proj_bias


if __name__ == "__main__":
    # Small config consistent with the module: hidden_size=32, num_labels=4,
    # batch=2, seq=8.
    B, S, H, L = 2, 8, 32, 4

    key = jax.random.PRNGKey(0)
    k_feat, k_w1, k_b1, k_w2, k_b2 = jax.random.split(key, 5)

    features = jax.random.normal(k_feat, (B, S, H), dtype=jnp.float32)
    # PyTorch nn.Linear layout: (out_features, in_features).
    dense_weight = jax.random.normal(k_w1, (H, H), dtype=jnp.float32) * 0.05
    dense_bias = jax.random.normal(k_b1, (H,), dtype=jnp.float32) * 0.05
    out_proj_weight = jax.random.normal(k_w2, (L, H), dtype=jnp.float32) * 0.05
    out_proj_bias = jax.random.normal(k_b2, (L,), dtype=jnp.float32) * 0.05

    out = residue_roberta_classification_head(
        features, dense_weight, dense_bias, out_proj_weight, out_proj_bias)
    out = jax.block_until_ready(out)

    ref = _reference(features, dense_weight, dense_bias, out_proj_weight,
                     out_proj_bias)
    assert out.shape == (B, L)
    assert jnp.allclose(out, ref, atol=1e-5, rtol=1e-5), "mismatch vs reference"

    # TODO(synk): dropout is omitted (eval-mode identity); training-mode dropout
    # would need pltpu.prng_seed / prng_random_bits masking in-kernel.
    print("KERNEL_OK")
</pallas_src>

<mosaic_0001>
module attributes {stable_mosaic.version = 11 : i64} {
  func.func @_head_kernel(%arg0: i32, %arg1: i32, %arg2: memref<2x8x32xf32, #tpu.memory_space<vmem>>, %arg3: memref<32x32xf32, #tpu.memory_space<vmem>>, %arg4: memref<1x32xf32, #tpu.memory_space<vmem>>, %arg5: memref<32x128xf32, #tpu.memory_space<vmem>>, %arg6: memref<1x128xf32, #tpu.memory_space<vmem>>, %arg7: memref<2x128xf32, #tpu.memory_space<vmem>>, %arg8: memref<2x32xf32, #tpu.memory_space<vmem>>) attributes {dimension_semantics = [#tpu.dimension_semantics<parallel>, #tpu.dimension_semantics<arbitrary>], iteration_bounds = array<i64: 1, 1>, scalar_prefetch = 0 : i64, scratch_operands = 1 : i64, tpu.core_type = #tpu.core_type<tc>, window_params = [{transform_indices = @transform_0, window_bounds = array<i64: 2, 8, 32>}, {pipeline_mode = #tpu.pipeline_mode<synchronous>, transform_indices = @transform_1, window_bounds = array<i64: 32, 32>}, {pipeline_mode = #tpu.pipeline_mode<synchronous>, transform_indices = @transform_2, window_bounds = array<i64: 1, 32>}, {pipeline_mode = #tpu.pipeline_mode<synchronous>, transform_indices = @transform_3, window_bounds = array<i64: 32, 128>}, {pipeline_mode = #tpu.pipeline_mode<synchronous>, transform_indices = @transform_4, window_bounds = array<i64: 1, 128>}, {transform_indices = @transform_5, window_bounds = array<i64: 2, 128>}]} {
    %c0_i32 = arith.constant 0 : i32
    %0 = arith.cmpi eq, %arg1, %c0_i32 : i32
    %1 = arith.extui %0 : i1 to i32
    %c0_i32_0 = arith.constant 0 : i32
    %2 = arith.cmpi ne, %1, %c0_i32_0 : i32
    scf.if %2 {
      %cst_9 = arith.constant 0.000000e+00 : f32
      %11 = vector.broadcast %cst_9 : f32 to vector<2x32xf32>
      %c0_10 = arith.constant 0 : index
      %c0_11 = arith.constant 0 : index
      %12 = vector.load %arg8[%c0_10, %c0_11] : memref<2x32xf32, #tpu.memory_space<vmem>>, vector<2x32xf32>
      tpu.vector_store %arg8[%c0_10, %c0_11], %11 {strides = array<i32>} : memref<2x32xf32, #tpu.memory_space<vmem>>, vector<2x32xf32>,
    } else {
    }
    %c0 = arith.constant 0 : index
    %c0_1 = arith.constant 0 : index
    %c0_2 = arith.constant 0 : index
    %3 = vector.load %arg2[%c0, %c0_1, %c0_2] : memref<2x8x32xf32, #tpu.memory_space<vmem>>, vector<2x8x32xf32>
    %c0_3 = arith.constant 0 : index
    %c0_4 = arith.constant 0 : index
    %4 = vector.load %arg8[%c0_3, %c0_4] : memref<2x32xf32, #tpu.memory_space<vmem>>, vector<2x32xf32>
    %cst = arith.constant dense<0.000000e+00> : vector<2x32xf32>
    %5 = vector.multi_reduction <add>, %3, %cst [1] : vector<2x8x32xf32> to vector<2x32xf32>
    %6 = arith.addf %4, %5 : vector<2x32xf32>
    %c0_5 = arith.constant 0 : index
    %c0_6 = arith.constant 0 : index
    %7 = vector.load %arg8[%c0_5, %c0_6] : memref<2x32xf32, #tpu.memory_space<vmem>>, vector<2x32xf32>
    tpu.vector_store %arg8[%c0_5, %c0_6], %6 {strides = array<i32>} : memref<2x32xf32, #tpu.memory_space<vmem>>, vector<2x32xf32>,
    %c0_i32_7 = arith.constant 0 : i32
    %8 = arith.cmpi eq, %arg1, %c0_i32_7 : i32
    %9 = arith.extui %8 : i1 to i32
    %c0_i32_8 = arith.constant 0 : i32
    %10 = arith.cmpi ne, %9, %c0_i32_8 : i32
    scf.if %10 {
      %c0_9 = arith.constant 0 : index
      %c0_10 = arith.constant 0 : index
      %11 = vector.load %arg8[%c0_9, %c0_10] : memref<2x32xf32, #tpu.memory_space<vmem>>, vector<2x32xf32>
      %cst_11 = arith.constant 1.250000e-01 : f32
      %12 = vector.broadcast %cst_11 : f32 to vector<2x32xf32>
      %13 = arith.mulf %11, %12 : vector<2x32xf32>
      %c0_12 = arith.constant 0 : index
      %c0_13 = arith.constant 0 : index
      %14 = vector.load %arg3[%c0_12, %c0_13] : memref<32x32xf32, #tpu.memory_space<vmem>>, vector<32x32xf32>
      %cst_14 = arith.constant dense<0.000000e+00> : vector<2x32xf32>
      %15 = tpu.matmul %13, %14, %cst_14 {dimension_numbers = #tpu.dot_dimension_numbers<[1], [0], [0], [1], [0, 0, 1, 1], [], []>} : vector<2x32xf32>, vector<32x32xf32>, vector<2x32xf32> -> vector<2x32xf32>
      %c0_15 = arith.constant 0 : index
      %c0_16 = arith.constant 0 : index
      %16 = vector.load %arg4[%c0_15, %c0_16] : memref<1x32xf32, #tpu.memory_space<vmem>>, vector<1x32xf32>
      %17 = vector.broadcast %16 : vector<1x32xf32> to vector<2x32xf32>
      %18 = arith.addf %15, %17 : vector<2x32xf32>
      %19 = math.tanh %18 : vector<2x32xf32>
      %c0_17 = arith.constant 0 : index
      %c0_18 = arith.constant 0 : index
      %20 = vector.load %arg5[%c0_17, %c0_18] : memref<32x128xf32, #tpu.memory_space<vmem>>, vector<32x128xf32>
      %cst_19 = arith.constant dense<0.000000e+00> : vector<2x128xf32>
      %21 = tpu.matmul %19, %20, %cst_19 {dimension_numbers = #tpu.dot_dimension_numbers<[1], [0], [0], [1], [0, 0, 1, 1], [], []>} : vector<2x32xf32>, vector<32x128xf32>, vector<2x128xf32> -> vector<2x128xf32>
      %c0_20 = arith.constant 0 : index
      %c0_21 = arith.constant 0 : index
      %22 = vector.load %arg6[%c0_20, %c0_21] : memref<1x128xf32, #tpu.memory_space<vmem>>, vector<1x128xf32>
      %23 = vector.broadcast %22 : vector<1x128xf32> to vector<2x128xf32>
      %24 = arith.addf %21, %23 : vector<2x128xf32>
      %c0_22 = arith.constant 0 : index
      %c0_23 = arith.constant 0 : index
      %25 = vector.load %arg7[%c0_22, %c0_23] : memref<2x128xf32, #tpu.memory_space<vmem>>, vector<2x128xf32>
      tpu.vector_store %arg7[%c0_22, %c0_23], %24 {strides = array<i32>} : memref<2x128xf32, #tpu.memory_space<vmem>>, vector<2x128xf32>,
    } else {
    }
    return
  }
  func.func @transform_0(%arg0: i32, %arg1: i32) -> (i32, i32, i32) {
    %c0_i32 = arith.constant 0 : i32
    %c0_i32_0 = arith.constant 0 : i32
    return %arg0, %arg1, %c0_i32 : i32, i32, i32
  }
  func.func @transform_1(%arg0: i32, %arg1: i32) -> (i32, i32) {
    %c0_i32 = arith.constant 0 : i32
    %c0_i32_0 = arith.constant 0 : i32
    %c0_i32_1 = arith.constant 0 : i32
    return %c0_i32, %c0_i32_0 : i32, i32
  }
  func.func @transform_2(%arg0: i32, %arg1: i32) -> (i32, i32) {
    %c0_i32 = arith.constant 0 : i32
    %c0_i32_0 = arith.constant 0 : i32
    %c0_i32_1 = arith.constant 0 : i32
    return %c0_i32, %c0_i32_0 : i32, i32
  }
  func.func @transform_3(%arg0: i32, %arg1: i32) -> (i32, i32) {
    %c0_i32 = arith.constant 0 : i32
    %c0_i32_0 = arith.constant 0 : i32
    %c0_i32_1 = arith.constant 0 : i32
    return %c0_i32, %c0_i32_0 : i32, i32
  }
  func.func @transform_4(%arg0: i32, %arg1: i32) -> (i32, i32) {
    %c0_i32 = arith.constant 0 : i32
    %c0_i32_0 = arith.constant 0 : i32
    %c0_i32_1 = arith.constant 0 : i32
    return %c0_i32, %c0_i32_0 : i32, i32
  }
  func.func @transform_5(%arg0: i32, %arg1: i32) -> (i32, i32) {
    %c0_i32 = arith.constant 0 : i32
    %c0_i32_0 = arith.constant 0 : i32
    return %arg0, %c0_i32 : i32, i32
  }
}

</mosaic_0001>

<bundles_post_ra>
// kernel: tpu_custom_call.1
= control target key start
LH: loop header
LB: loop body
LE: loop exit
PB: predicated region body
PF: predicated region fallthrough
CT: control target
= control target key end

     0   :  { %10 = vsyncpa [#allocation4], 0  ;;  %s479_s0 = inlined_call_operand.hbm [shape: f32[2,8,32], index: 0, kind: input, shape index: {}]   ;;  %s480_s1 = inlined_call_operand.hbm [shape: f32[32,32], index: 1, kind: input, shape index: {}]   ;;  %s481_s2 = inlined_call_operand.vmem [shape: f32[1,32], index: 2, kind: input, shape index: {}]   ;;  %s482_s3 = inlined_call_operand.hbm [shape: f32[32,128], index: 3, kind: input, shape index: {}]   ;;  %s483_s4 = inlined_call_operand.vmem [shape: f32[1,128], index: 4, kind: input, shape index: {}]   ;;  %s484_s5 = inlined_call_operand.hbm [shape: f32[2,128], index: 5, kind: output, shape index: {}]  }
   0x1   :  { %11 = vsyncpa [#allocation7], 0 }
   0x2   :  { %12 = vsyncpa [#allocation5], 0  ;;  %s417_s18 = smov [#allocation6]   ;;  %s418_s20 = smov [#allocation3]  }
   0x3   :  { %s30_s19 = sshll.u32 %s417_s18, 4  ;;  %s18_s21 = sshll.u32 %s418_s20, 4  ;;  %s31_s19 = int_to_ptr.vmem [resolvable:$true] %s30_s19  ;;  %s19_s21 = int_to_ptr.vmem [resolvable:$true] %s18_s21 }
   0x4   :  { %s339_s22 = scalar_lea.vmem %s31_s19, 512  ;;  %p344_p1 = scmp.lt.s32.totalorder %s31_s19, %s31_s19 }
   0x5   :  { %p340_p0 = scmp.ne.s32.totalorder %s31_s19, %s339_s22  ;;  %p345_p2 = scmp.lt.s32.totalorder %s339_s22, %s339_s22 }
   0x7   :  { %p346_p3 = por %p345_p2, %p344_p1 }
   0x9   :  { %p347_p4 = pnand %p346_p3, %p340_p0 }
   0xb   :  { %350 = shalt.err (!%p347_p4)
}
   0xc   :  { %s419_s23 = smov 128   ;;  %s420_s24 = smov 8  }
   0xd   :  { %36 = dma.hbm_to_vmem [thread:$0]  %s480_s1, 512, %s31_s19, [#allocation7], %s419_s23, %s419_s23, %s420_s24  }
   0xe   :  { %s359_s27 = scalar_lea.vmem %s19_s21, 256  ;;  %p364_p6 = scmp.lt.s32.totalorder %s19_s21, %s19_s21 }
   0xf   :  { %p360_p5 = scmp.ne.s32.totalorder %s19_s21, %s359_s27  ;;  %p365_p7 = scmp.lt.s32.totalorder %s359_s27, %s359_s27 }
  0x11   :  { %p366_p8 = por %p365_p7, %p364_p6 }
  0x13   :  { %p367_p9 = pnand %p366_p8, %p360_p5 }
  0x15   :  { %370 = shalt.err (!%p367_p9)
}
  0x16   :  { %24 = dma.hbm_to_vmem [thread:$0]  %s479_s0, 256, %s19_s21, [#allocation4], %s419_s23, %s419_s23, %s420_s24  }
  0x17   :  { %s421_s30 = smov [#allocation8]  }
  0x18   :  { %s44_s6 = sshll.u32 %s421_s30, 4  ;;  %s45_s6 = int_to_ptr.vmem [resolvable:$true] %s44_s6 }
  0x19   :  { %s379_s7 = scalar_lea.vmem %s45_s6, 512  ;;  %p384_p11 = scmp.lt.s32.totalorder %s45_s6, %s45_s6 }
  0x1a   :  { %p380_p10 = scmp.ne.s32.totalorder %s45_s6, %s379_s7  ;;  %p385_p12 = scmp.lt.s32.totalorder %s379_s7, %s379_s7 }
  0x1c   :  { %p386_p13 = por %p385_p12, %p384_p11 }
  0x1e   :  { %p387_p0 = pnand %p386_p13, %p380_p10 }
  0x20   :  { %390 = shalt.err (!%p387_p0)
}
  0x21   :  { %50 = dma.hbm_to_vmem [thread:$0]  %s482_s3, 512, %s45_s6, [#allocation7], %s419_s23, %s419_s23, %s420_s24  }
  0x22   :  { %411 = dma.done.wait [#allocation4], 256  }
  0x23   :  { %412 = vsyncadd [#allocation4], 4294967040 }
  0x24   :  { %413 = dma.done.wait [#allocation7], 1024  }
  0x25   :  { %414 = vsyncadd [#allocation7], 4294966272  ;;  %vm66_vm0 = vcmask 254976   ;;  %v422_v0 = vmov 0.0   ;;  %vm423_vm1 = vmmov 0   ;;  %vm71_vm2 = vcmask 261120  }
  0x26   :  { %299 = vmatprep.subr.mxu0 %v422_v0  ;;  %307 = vmatprep.mubr.msk.f32.mxu0 %vm423_vm1, %v422_v0  ;;  %67 = vst.msk [vmem:[#allocation2] sm:$0x3] %vm66_vm0, %v422_v0  ;;  %v102_v1 = vld [vmem:[#allocation6 + $0x18] sm:$0xff]  ;;  %v101_v2 = vld [vmem:[#allocation6 + $0x10] sm:$0xff]  ;;  %v100_v5 = vld [vmem:[#allocation6 + $0x8] sm:$0xff]  ;;  %vm88_vm3 = vcmask 1041409  }
  0x27   :  { %310 = vmatprep.subr.mxu1 %v422_v0  ;;  %318 = vmatprep.mubr.msk.f32.mxu1 %vm423_vm1, %v422_v0  ;;  %v68_v3 = vld [vmem:[#allocation3] sm:$0xff]  ;;  %v69_v4 = vld [vmem:[#allocation3 + $0x8] sm:$0xff]  ;;  %v99_v10 = vld [vmem:[#allocation6] sm:$0xff]  ;;  %s424_s11 = smov [#allocation9]  }
  0x28   :  { %300 = vmatpush3.msra.mxu0 %v102_v1  ;;  %v72_v6 = vsel %vm71_vm2, %v68_v3, 0.0  ;;  %v79_v7 = vsel %vm71_vm2, %v69_v4, 0.0  ;;  %v187_v26 = vld [vmem:[#allocation8 + $0x18] sm:$0xff]  ;;  %v186_v27 = vld [vmem:[#allocation8 + $0x10] sm:$0xff]  ;;  %v185_v28 = vld [vmem:[#allocation8 + $0x8] sm:$0xff]  ;;  %s275_s12 = sshll.u32 %s424_s11, 4  ;;  %s276_s12 = int_to_ptr.vmem [resolvable:$true] %s275_s12 }
  0x29   :  { %301 = vmatprep.subr.mxu0 %v422_v0  ;;  %v73_v8 = vrot.slane %v72_v6, 4  ;;  %v80_v9 = vrot.slane %v79_v7, 4  ;;  %311 = vmatpush3.msra.mxu1 %v187_v26  ;;  %v184_v29 = vld [vmem:[#allocation8] sm:$0xff]  ;;  %v285_v30 = vld [vmem:[%s481_s2] ss:$0 sm:$0xff]  ;;  %s391_s13 = scalar_lea.vmem %s276_s12, 32  ;;  %p396_p2 = scmp.lt.s32.totalorder %s276_s12, %s276_s12 }
  0x2a   :  { %302 = vmatpush3.msra.mxu0 %v101_v2  ;;  %312 = vmatprep.subr.mxu1 %v422_v0  ;;  %v287_v35 = vld [vmem:[%s483_s4] ss:$0 sm:$0xff]  ;;  %p392_p1 = scmp.ne.s32.totalorder %s276_s12, %s391_s13  ;;  %p397_p3 = scmp.lt.s32.totalorder %s391_s13, %s391_s13 }
  0x2b   :  { %303 = vmatprep.subr.mxu0 %v422_v0  ;;  %v74_v11 = vadd.f32 %v73_v8, %v72_v6  ;;  %v81_v12 = vadd.f32 %v80_v9, %v79_v7  ;;  %313 = vmatpush3.msra.mxu1 %v186_v27 }
  0x2c   :  { %304 = vmatpush3.msra.mxu0 %v100_v5  ;;  %314 = vmatprep.subr.mxu1 %v422_v0  ;;  %p398_p4 = por %p397_p3, %p396_p2 }
  0x2d   :  { %305 = vmatprep.subr.mxu0 %v422_v0  ;;  %v75_v13 = vrot.slane %v74_v11, 2  ;;  %v82_v14 = vrot.slane %v81_v12, 2  ;;  %v70_v19 = vld [vmem:[#allocation2] sm:$0x3]  ;;  %315 = vmatpush3.msra.mxu1 %v185_v28 }
  0x2e   :  { %306 = vmatpush3.msra.mxu0 %v99_v10  ;;  %316 = vmatprep.subr.mxu1 %v422_v0  ;;  %p399_p5 = pnand %p398_p4, %p392_p1 }
  0x2f   :  { %v76_v15 = vadd.f32 %v75_v13, %v74_v11  ;;  %v83_v16 = vadd.f32 %v82_v14, %v81_v12  ;;  %317 = vmatpush3.msra.mxu1 %v184_v29 }
  0x31   :  { %v77_v17 = vrot.slane %v76_v15, 1  ;;  %v84_v18 = vrot.slane %v83_v16, 1 }
  0x33   :  { %v78_v20 = vadd.f32 %v77_v17, %v76_v15  ;;  %v85_v21 = vadd.f32 %v84_v18, %v83_v16 }
  0x35   :  { %v89_v22 = vsel %vm88_vm3, %v85_v21, %v78_v20 }
  0x36   :  { %v91_v23 = vadd.f32 %v89_v22, %v70_v19 }
  0x38   :  { %93 = vst.msk [vmem:[#allocation2] sm:$0x3] %vm66_vm0, %v91_v23 }
  0x3f   :  { %v97_v24 = vld [vmem:[#allocation2] sm:$0x3] }
  0x40   :  { %v98_v25 = vmul.f32 0.125, %v97_v24 }
  0x42   :  { %308 = vmatmul.mubr.msk.f32.vlgmr.msra.gmra.mxu0 %vm71_vm2, %v98_v25 }
 0x102   :  { %v179_v31 = vpop.f32.mrf.mxu0 }
 0x103   :  { %v180_v32 = vadd.f32 %v285_v30, %v179_v31 }
 0x104   :  { %v309_v33 = vpop.f32.mrf.mxu0 }
 0x105   :  { %329 = vtanh.f32 %v180_v32 }
 0x112   :  { %v330_v34 = vpop.eup %329 }
 0x113   :  { %319 = vmatmul.mubr.msk.f32.vlgmr.msra.gmra.mxu1 %vm71_vm2, %v330_v34 }
 0x1d3   :  { %v264_v36 = vpop.f32.mrf.mxu1 }
 0x1d4   :  { %v265_v37 = vadd.f32 %v287_v35, %v264_v36 }
 0x1d5   :  { %v320_v38 = vpop.f32.mrf.mxu1 }
 0x1d6   :  { %268 = vst [vmem:[#allocation9] sm:$0x3] %v265_v37 }
 0x1d7   :  { %402 = shalt.err (!%p399_p5)
}
 0x1d8   :  { %278 = dma.vmem_to_hbm [thread:$0]  %s276_s12, 32, %s484_s5, [#allocation5]  }
 0x1d9   :  { %415 = dma.done.wait [#allocation5], 32  }
 0x1da   :  { %416 = vsyncadd [#allocation5], 4294967264 }
 0x1db   :  { %282 = vsyncpa [#allocation4], 1 }
 0x1dc   :  { %283 = vsyncpa [#allocation7], 1 }
 0x1dd   :  { %284 = vsyncpa [#allocation5], 1 }

</bundles_post_ra>
